<compile_context>
chip_gen: v5e
topology: v5e:2x2
jax: 0.10.0
libtpu: 0.0.40
codegen_flags: <defaults>
</compile_context>

<pallas_src>
import jax
import jax.numpy as jnp
from jax.experimental import pallas as pl
from jax.experimental.pallas import tpu as pltpu


def _identity_interaction_kernel(h1_ref, h2_ref, o1_ref, o2_ref):
    # TODO(synk): BaseInteraction.forward is abstract (raises NotImplementedError);
    # concrete subclasses replace this pass-through body with real interaction math.
    o1_ref[...] = h1_ref[...]
    o2_ref[...] = h2_ref[...]


# Per-block VMEM budget. The pipeline keeps ~8 live blocks
# (2 inputs + 2 outputs, double-buffered), so 2 MiB blocks -> ~16 MiB of VMEM,
# comfortably inside the 32 MiB scoped limit on every generation (incl. v7x).
_BLOCK_BUDGET_BYTES = 2 * 1024 * 1024
_VMEM_LIMIT_BYTES = 32 * 1024 * 1024


def _sublane_granularity(itemsize: int) -> int:
    # Packed-sublane tile: 8 rows for 4-byte, 16 for 2-byte, 32 for 1-byte dtypes.
    return max(8, 32 // itemsize)


def _lane_dense_view(total: int):
    """Pick a lane-dense (rows, lanes) factorization of the flat element count."""
    for lanes in (1024, 512, 256, 128):
        if total % lanes == 0:
            return total // lanes, lanes
    return None


def _choose_row_tile(rows: int, row_bytes: int, gran: int) -> int:
    """Largest sublane-aligned row tile whose block fits the per-block budget."""
    by_budget = _BLOCK_BUDGET_BYTES // max(row_bytes, 1)
    tile = min(rows, max(by_budget, 1))
    if tile >= gran:
        tile = (tile // gran) * gran  # sublane-aligned; ragged last block is fine
    else:
        tile = rows  # tiny array: single full block (always layout-legal)
    return max(tile, 1)


def base_interaction(hidden1: jax.Array, hidden2: jax.Array, *, use_kernel: bool = False, **config):
    """Pallas implementation of BaseInteraction.forward (identity pass-through).

    hidden1, hidden2: (..., H) with matching shapes/dtypes.
    returns: (hidden1, hidden2) unchanged.

    Default path returns the inputs directly (zero HBM traffic).  The kernel
    path (use_kernel=True) routes through a Pallas copy kernel as the scaffold
    for concrete interaction subclasses.  Note: the kernel path donates its
    (reshaped) inputs via input_output_aliases; callers under jit should not
    reuse those buffers afterwards.
    """
    assert hidden1.shape == hidden2.shape, "base interaction expects matching shapes"
    assert hidden1.dtype == hidden2.dtype, "base interaction expects matching dtypes"

    if not use_kernel:
        # Fast path: identity needs no kernel launch at all.
        return hidden1, hidden2

    orig_shape = hidden1.shape
    dtype = hidden1.dtype
    itemsize = jnp.dtype(dtype).itemsize
    total = 1
    for d in orig_shape:
        total *= d

    gran = _sublane_granularity(itemsize)
    view = _lane_dense_view(total)

    if view is not None:
        rows, lanes = view
        flat_shape = (rows, lanes)
        tile_rows = _choose_row_tile(rows, lanes * itemsize, gran)
        grid = (pl.cdiv(rows, tile_rows),)
        spec = pl.BlockSpec((tile_rows, lanes), lambda i: (i, 0))
    else:
        # TODO(synk): element counts with no 128-lane factor; tile the flat 1-D
        # buffer in 128-aligned chunks (ragged last block handled by cdiv).
        flat_shape = (total,)
        if total >= 128:
            chunk = min((_BLOCK_BUDGET_BYTES // itemsize) // 128 * 128,
                        (total // 128) * 128)
            chunk = max(chunk, 128)
        else:
            chunk = total  # tiny odd array: single full block
        grid = (pl.cdiv(total, chunk),)
        spec = pl.BlockSpec((chunk,), lambda i: (i,))

    h1 = hidden1.reshape(flat_shape)
    h2 = hidden2.reshape(flat_shape)
    out_shape = jax.ShapeDtypeStruct(flat_shape, dtype)

    o1, o2 = pl.pallas_call(
        _identity_interaction_kernel,
        out_shape=(out_shape, out_shape),
        grid=grid,
        in_specs=[spec, spec],
        out_specs=(spec, spec),
        # Alias each hidden buffer with its corresponding output (identity op).
        input_output_aliases={0: 0, 1: 1},
        cost_estimate=pl.CostEstimate(
            flops=0,
            transcendentals=0,
            bytes_accessed=4 * total * itemsize,  # read + write of both tensors
        ),
        compiler_params=pltpu.CompilerParams(
            dimension_semantics=("parallel",),
            vmem_limit_bytes=_VMEM_LIMIT_BYTES,
        ),
    )(h1, h2)

    return o1.reshape(orig_shape), o2.reshape(orig_shape)


if __name__ == "__main__":
    key = jax.random.PRNGKey(0)
    k1, k2 = jax.random.split(key)

    B, S, H = 2, 8, 32
    hidden1 = jax.random.normal(k1, (B, S, H), dtype=jnp.float32)
    hidden2 = jax.random.normal(k2, (B, S, H), dtype=jnp.float32)

    # Fast path (recommended for the pure-identity base class): no kernel launch.
    f1, f2 = base_interaction(hidden1, hidden2)

    # Kernel path: exercises the Pallas pipeline the subclasses would build on.
    o1, o2 = base_interaction(hidden1, hidden2, use_kernel=True)
    jax.block_until_ready((f1, f2, o1, o2))

    for out, ref in ((f1, hidden1), (f2, hidden2), (o1, hidden1), (o2, hidden2)):
        assert out.shape == ref.shape and out.dtype == ref.dtype
        assert bool(jnp.allclose(out, ref))

    print("KERNEL_OK")
</pallas_src>

<mosaic_0001>
module attributes {stable_mosaic.version = 11 : i64} {
  func.func @_identity_interaction_kernel(%arg0: i32, %arg1: memref<1x512xf32, #tpu.memory_space<vmem>>, %arg2: memref<1x512xf32, #tpu.memory_space<vmem>>, %arg3: memref<1x512xf32, #tpu.memory_space<vmem>>, %arg4: memref<1x512xf32, #tpu.memory_space<vmem>>) attributes {dimension_semantics = [#tpu.dimension_semantics<parallel>], iteration_bounds = array<i64: 1>, scalar_prefetch = 0 : i64, scratch_operands = 0 : i64, tpu.core_type = #tpu.core_type<tc>, window_params = [{transform_indices = @transform_0, window_bounds = array<i64: 1, 512>}, {transform_indices = @transform_1, window_bounds = array<i64: 1, 512>}, {transform_indices = @transform_2, window_bounds = array<i64: 1, 512>}, {transform_indices = @transform_3, window_bounds = array<i64: 1, 512>}]} {
    %c0 = arith.constant 0 : index
    %c0_0 = arith.constant 0 : index
    %0 = vector.load %arg1[%c0, %c0_0] : memref<1x512xf32, #tpu.memory_space<vmem>>, vector<1x512xf32>
    %c0_1 = arith.constant 0 : index
    %c0_2 = arith.constant 0 : index
    %1 = vector.load %arg3[%c0_1, %c0_2] : memref<1x512xf32, #tpu.memory_space<vmem>>, vector<1x512xf32>
    tpu.vector_store %arg3[%c0_1, %c0_2], %0 {strides = array<i32>} : memref<1x512xf32, #tpu.memory_space<vmem>>, vector<1x512xf32>,
    %c0_3 = arith.constant 0 : index
    %c0_4 = arith.constant 0 : index
    %2 = vector.load %arg2[%c0_3, %c0_4] : memref<1x512xf32, #tpu.memory_space<vmem>>, vector<1x512xf32>
    %c0_5 = arith.constant 0 : index
    %c0_6 = arith.constant 0 : index
    %3 = vector.load %arg4[%c0_5, %c0_6] : memref<1x512xf32, #tpu.memory_space<vmem>>, vector<1x512xf32>
    tpu.vector_store %arg4[%c0_5, %c0_6], %2 {strides = array<i32>} : memref<1x512xf32, #tpu.memory_space<vmem>>, vector<1x512xf32>,
    return
  }
  func.func @transform_0(%arg0: i32) -> (i32, i32) {
    %c0_i32 = arith.constant 0 : i32
    %c0_i32_0 = arith.constant 0 : i32
    return %arg0, %c0_i32 : i32, i32
  }
  func.func @transform_1(%arg0: i32) -> (i32, i32) {
    %c0_i32 = arith.constant 0 : i32
    %c0_i32_0 = arith.constant 0 : i32
    return %arg0, %c0_i32 : i32, i32
  }
  func.func @transform_2(%arg0: i32) -> (i32, i32) {
    %c0_i32 = arith.constant 0 : i32
    %c0_i32_0 = arith.constant 0 : i32
    return %arg0, %c0_i32 : i32, i32
  }
  func.func @transform_3(%arg0: i32) -> (i32, i32) {
    %c0_i32 = arith.constant 0 : i32
    %c0_i32_0 = arith.constant 0 : i32
    return %arg0, %c0_i32 : i32, i32
  }
}

</mosaic_0001>

<bundles_post_ra>
// kernel: tpu_custom_call.1
= control target key start
LH: loop header
LB: loop body
LE: loop exit
PB: predicated region body
PF: predicated region fallthrough
CT: control target
= control target key end

     0   :  { %9 = vsyncpa [#allocation3], 0  ;;  %s229_s0 = inlined_call_operand.hbm [shape: f32[1,512], index: 0, kind: input, shape index: {}, may-alias: {0,2}]   ;;  %s230_s1 = inlined_call_operand.hbm [shape: f32[1,512], index: 1, kind: input, shape index: {}, may-alias: {1,3}]   ;;  %s231_s2 = inlined_call_operand.hbm [shape: f32[1,512], index: 2, kind: output, shape index: {0}, may-alias: {0,2}]   ;;  %s232_s3 = inlined_call_operand.hbm [shape: f32[1,512], index: 3, kind: output, shape index: {1}, may-alias: {1,3}]  }
   0x1   :  { %10 = vsyncpa [#allocation6], 0 }
   0x2   :  { %11 = vsyncpa [#allocation4], 0 }
   0x3   :  { %12 = vsyncpa [#allocation9], 0  ;;  %s18_s14 = sshll.u32 %s229_s0, 4  ;;  %s193_s15 = smov [#allocation2]   ;;  %s19_s14 = int_to_ptr.hbm [resolvable:$true] %s18_s14 }
   0x4   :  { %s20_s16 = sshll.u32 %s193_s15, 4  ;;  %s29_s19 = sshll.u32 %s230_s1, 4  ;;  %s21_s16 = int_to_ptr.vmem [resolvable:$true] %s20_s16  ;;  %s30_s19 = int_to_ptr.hbm [resolvable:$true] %s29_s19 }
   0x5   :  { %23 = dma.hbm_to_vmem [thread:$0]  %s19_s14, 64, %s21_s16, [#allocation3]  }
   0x6   :  { %s194_s20 = smov [#allocation5]  }
   0x7   :  { %s31_s21 = sshll.u32 %s194_s20, 4  ;;  %s32_s21 = int_to_ptr.vmem [resolvable:$true] %s31_s21 }
   0x8   :  { %34 = dma.hbm_to_vmem [thread:$0]  %s30_s19, 64, %s32_s21, [#allocation6]  }
   0x9   :  { %185 = dma.done.wait [#allocation3], 64  }
   0xa   :  { %186 = vsyncadd [#allocation3], 4294967232 }
   0xb   :  { %187 = dma.done.wait [#allocation6], 64  }
   0xc   :  { %188 = vsyncadd [#allocation6], 4294967232  ;;  %v44_v0 = vlaneseq  ;;  %s195_s0 = smov [#allocation7]   ;;  %s58_s25 = sshll.u32 %s231_s2, 4  ;;  %v43_v1 = vld [vmem:[#allocation2] sm:$0xf]  ;;  %s59_s25 = int_to_ptr.hbm [resolvable:$true] %s58_s25 }
   0xd   :  { %s56_s22 = sshll.u32 %s195_s0, 4  ;;  %s196_s26 = smov [#allocation8]   ;;  %v49_v2 = vld [vmem:[#allocation5] sm:$0xf]  ;;  %s57_s22 = int_to_ptr.vmem [resolvable:$true] %s56_s22 }
   0xe   :  { %s67_s27 = sshll.u32 %s196_s26, 4  ;;  %s69_s29 = sshll.u32 %s232_s3, 4  ;;  %vm46_vm0 = vcmp.lt.s32.totalorder %v44_v0, 512  ;;  %s68_s27 = int_to_ptr.vmem [resolvable:$true] %s67_s27  ;;  %s70_s29 = int_to_ptr.hbm [resolvable:$true] %s69_s29 }
   0xf   :  { %48 = vst.msk [vmem:[#allocation7] sm:$0xf] %vm46_vm0, %v43_v1 }
  0x10   :  { %50 = vst.msk [vmem:[#allocation8] sm:$0xf] %vm46_vm0, %v49_v2  ;;  %61 = dma.vmem_to_hbm [thread:$0]  %s57_s22, 64, %s59_s25, [#allocation4]  }
  0x11   :  { %72 = dma.vmem_to_hbm [thread:$0]  %s68_s27, 64, %s70_s29, [#allocation9]  }
  0x12   :  { %189 = dma.done.wait [#allocation4], 64  }
  0x13   :  { %190 = vsyncadd [#allocation4], 4294967232 }
  0x14   :  { %191 = dma.done.wait [#allocation9], 64  }
  0x15   :  { %192 = vsyncadd [#allocation9], 4294967232 }
  0x16   :  { %81 = vsyncpa [#allocation3], 1 }
  0x17   :  { %82 = vsyncpa [#allocation6], 1 }
  0x18   :  { %83 = vsyncpa [#allocation4], 1 }
  0x19   :  { %84 = vsyncpa [#allocation9], 1 }

</bundles_post_ra>
